<compile_context>
chip_gen: v6e
topology: v6e:2x2x1
jax: 0.10.0
libtpu: 0.0.40
codegen_flags: <defaults>
</compile_context>

<pallas_src>
from functools import partial

import numpy as np
import jax
import jax.numpy as jnp
from jax.experimental import pallas as pl
from jax.experimental.pallas import tpu as pltpu


# ------------------------- Pallas kernel (hot path) -------------------------

def _make_per_class_max_kernel(num_cls):
    def kernel(feat_ref, out_ref, acc_ref):
        # feat_ref block: (1, 1, 5+num_cls, HW)  -- one anchor's channel group
        # out_ref  block: (1, num_cls, 1)        -- resident across the anchor axis
        # acc_ref  scratch: (num_cls, 1) f32     -- running per-class max
        a = pl.program_id(1)

        obj_logit = feat_ref[0, 0, pl.ds(4, 1), :].astype(jnp.float32)         # (1, HW)
        cls_logits = feat_ref[0, 0, pl.ds(5, num_cls), :].astype(jnp.float32)  # (num_cls, HW)

        # numerically stable softmax over the class (sublane) axis
        m = jnp.max(cls_logits, axis=0, keepdims=True)            # (1, HW)
        e = jnp.exp(cls_logits - m)                                # (num_cls, HW)
        s = jnp.sum(e, axis=0, keepdims=True)                      # (1, HW)

        # sigmoid(obj) * softmax(cls) = e * 1/((1 + exp(-obj)) * s):
        # a single EUP reciprocal per column replaces num_cls*HW divides
        # and the separate sigmoid divide.  (obj * cls == config.loss_target)
        scale = pl.reciprocal((1.0 + jnp.exp(-obj_logit)) * s, approx=True)
        conf = e * scale                                           # (num_cls, HW)

        tile_max = jnp.max(conf, axis=1, keepdims=True)            # (num_cls, 1)

        @pl.when(a == 0)
        def _init():
            acc_ref[...] = tile_max

        @pl.when(a > 0)
        def _accum():
            acc_ref[...] = jnp.maximum(acc_ref[...], tile_max)

        @pl.when(a == pl.num_programs(1) - 1)
        def _store():
            out_ref[0, :, :] = acc_ref[...]

    return kernel


@partial(jax.jit, static_argnums=(1, 2))
def per_class_max_pallas(output_patch, num_anchor, num_cls):
    """output_patch: (B, (5+num_cls)*num_anchor, H, W) raw conv output (NCHW).

    Returns (B, num_cls): out[b, c] = max_{anchor,hw} sigmoid(obj) * softmax_c(cls).
    """
    B, C, H, W = output_patch.shape
    assert C == (5 + num_cls) * num_anchor
    hw = H * W
    # Free reshape: the channel axis already factors as (anchor, 5+num_cls)
    # in memory -- no transpose, no extra HBM round trip.
    feat = output_patch.reshape(B, num_anchor, 5 + num_cls, hw)

    # NOTE: on v6e/v7x the exp/elementwise math could run in bf16 (and on v5e
    # a bf16 feat would halve DMA bytes if the producer emits bf16); kept f32
    # here for portability and exact parity with the reference module.
    out = pl.pallas_call(
        _make_per_class_max_kernel(num_cls),
        out_shape=jax.ShapeDtypeStruct((B, num_cls, 1), jnp.float32),
        grid_spec=pltpu.PrefetchScalarGridSpec(
            num_scalar_prefetch=0,
            grid=(B, num_anchor),                       # anchor (reduction) axis last
            in_specs=[pl.BlockSpec((1, 1, 5 + num_cls, hw),
                                   lambda b, a: (b, a, 0, 0))],
            out_specs=pl.BlockSpec((1, num_cls, 1), lambda b, a: (b, 0, 0)),
            scratch_shapes=[pltpu.VMEM((num_cls, 1), jnp.float32)],
        ),
        compiler_params=pltpu.CompilerParams(
            dimension_semantics=("parallel", "arbitrary")),
    )(feat)
    return out[:, :, 0]


def reference_per_class_max(output_patch, num_anchor, num_cls):
    """Plain-JAX reference mirroring the PyTorch transform (transpose path)."""
    B, C, H, W = output_patch.shape
    x = output_patch.reshape(B, num_anchor, 5 + num_cls, H * W)
    x = jnp.transpose(x, (0, 2, 1, 3)).reshape(B, 5 + num_cls, num_anchor * H * W)
    obj = jax.nn.sigmoid(x[:, 4, :])
    probs = jax.nn.softmax(x[:, 5:5 + num_cls, :], axis=1)
    return jnp.max(probs * obj[:, None, :], axis=-1)


# ------------------------------ glue / module -------------------------------

class Config:
    """Minimal stand-in for the attack config object."""
    def __init__(self, class_id):
        self.class_id = class_id

    @staticmethod
    def loss_target(obj, cls):
        return obj * cls


class DetectionsYolov2:
    def __init__(self, weight_cls, weight_others, cls_id, num_cls, config,
                 num_anchor, clean_img_conf, conf_threshold):
        self.weight_targeted = weight_cls
        self.weight_untargeted = weight_others
        self.cls_id = cls_id
        self.num_cls = num_cls
        self.config = config
        self.num_anchor = num_anchor
        self.clean_img_conf = clean_img_conf
        self.conf_threshold = conf_threshold

    def forward(self, lab_batch, output_patch, img_names):
        B, C, H, W = output_patch.shape
        assert C == (5 + self.num_cls) * self.num_anchor

        # Hot path on TPU (kernel hard-codes config.loss_target(obj, cls) = obj*cls):
        #   per_class_max[b, c] = max_{anchor,hw} sigmoid(obj) * softmax_c(cls)
        per_class_max = per_class_max_pallas(output_patch, self.num_anchor, self.num_cls)

        # TODO(synk): the id selection (np.unique over label ids + dict lookups
        # keyed by image-name strings + threshold on clean confidences) is
        # inherently host-side and mirrors the reference's .cpu() round trip on
        # lab_batch.  Only the tiny label tensor crosses to host; the Pallas
        # result and the loss arithmetic stay on device.
        lab_host = np.asarray(jax.device_get(lab_batch))[:, :, 0]
        sel_mask = np.zeros((B, self.num_cls), dtype=np.float32)
        clean_conf = np.zeros((B, self.num_cls), dtype=np.float32)
        valid_rows = []
        for i in range(B):
            vals = lab_host[i]
            ids = np.unique(
                vals[(vals >= 0) & (vals != self.config.class_id)].astype(int))
            kept_any = False
            for lab_id in ids:
                c = float(self.clean_img_conf[img_names[i]][int(lab_id)])
                if c > self.conf_threshold:
                    sel_mask[i, int(lab_id)] = 1.0
                    clean_conf[i, int(lab_id)] = c
                    kept_any = True
            if kept_any:
                valid_rows.append(i)

        if valid_rows:
            mask_d = jnp.asarray(sel_mask)
            clean_d = jnp.asarray(clean_conf)
            per_img = (jnp.sum(jnp.abs(clean_d - per_class_max) * mask_d, axis=1)
                       / jnp.maximum(jnp.sum(mask_d, axis=1), 1.0))
            total_loss = per_img[jnp.asarray(np.array(valid_rows, dtype=np.int32))]
        else:
            total_loss = jnp.zeros((1,), jnp.float32)

        max_conf = per_class_max[:, self.cls_id]                    # (B,)
        return (self.weight_targeted * max_conf,
                self.weight_untargeted * total_loss)


# ---------------------------------- main -------------------------------------

if __name__ == "__main__":
    key = jax.random.PRNGKey(0)
    B, num_cls, num_anchor, H, W = 2, 8, 5, 8, 8
    C = (5 + num_cls) * num_anchor                 # 65
    k1, k2 = jax.random.split(key)

    output_patch = jax.random.normal(k1, (B, C, H, W), dtype=jnp.float32)

    # lab_batch: (B, max_lab, 5) -- column 0 is the class id, -1 = padding slot
    max_lab = 4
    cls_col = jnp.array([[1, 3, 3, -1],
                         [2, 0, 5, -1]], dtype=jnp.float32)[..., None]
    rest = jax.random.uniform(k2, (B, max_lab, 4), dtype=jnp.float32)
    lab_batch = jnp.concatenate([cls_col, rest], axis=-1)

    img_names = [f"img_{i}" for i in range(B)]
    clean_img_conf = {name: {c: 0.3 + 0.05 * c for c in range(num_cls)}
                      for name in img_names}

    module = DetectionsYolov2(
        weight_cls=1.0, weight_others=0.5, cls_id=0, num_cls=num_cls,
        config=Config(class_id=0), num_anchor=num_anchor,
        clean_img_conf=clean_img_conf, conf_threshold=0.25)

    targeted, untargeted = module.forward(lab_batch, output_patch, img_names)
    jax.block_until_ready(targeted)
    jax.block_until_ready(untargeted)

    # sanity-check the Pallas hot path against the plain-JAX (transpose-path)
    # reference; tolerance loosened to cover the approx EUP reciprocal.
    ref = reference_per_class_max(output_patch, num_anchor, num_cls)
    got = per_class_max_pallas(output_patch, num_anchor, num_cls)
    assert jnp.allclose(got, ref, atol=2e-3, rtol=2e-3), "pallas/ref mismatch"
    assert jnp.allclose(targeted, 1.0 * ref[:, 0], atol=2e-3, rtol=2e-3), \
        "targeted branch mismatch"

    print("KERNEL_OK")
</pallas_src>

<mosaic_0001>
module attributes {stable_mosaic.version = 11 : i64} {
  func.func @kernel(%arg0: i32, %arg1: i32, %arg2: memref<1x1x13x64xf32, #tpu.memory_space<vmem>>, %arg3: memref<1x8x1xf32, #tpu.memory_space<vmem>>, %arg4: memref<8x1xf32, #tpu.memory_space<vmem>>) attributes {dimension_semantics = [#tpu.dimension_semantics<parallel>, #tpu.dimension_semantics<arbitrary>], iteration_bounds = array<i64: 2, 5>, scalar_prefetch = 0 : i64, scratch_operands = 1 : i64, tpu.core_type = #tpu.core_type<tc>, window_params = [{transform_indices = @transform_0, window_bounds = array<i64: 1, 1, 13, 64>}, {transform_indices = @transform_1, window_bounds = array<i64: 1, 8, 1>}]} {
    %c0 = arith.constant 0 : index
    %c0_0 = arith.constant 0 : index
    %c4 = arith.constant 4 : index
    %c0_1 = arith.constant 0 : index
    %0 = vector.load %arg2[%c0, %c0_0, %c4, %c0_1] : memref<1x1x13x64xf32, #tpu.memory_space<vmem>>, vector<1x1x1x64xf32>
    %1 = vector.shape_cast %0 : vector<1x1x1x64xf32> to vector<1x64xf32>
    %c0_2 = arith.constant 0 : index
    %c0_3 = arith.constant 0 : index
    %c5 = arith.constant 5 : index
    %c0_4 = arith.constant 0 : index
    %2 = vector.load %arg2[%c0_2, %c0_3, %c5, %c0_4] : memref<1x1x13x64xf32, #tpu.memory_space<vmem>>, vector<1x1x8x64xf32>
    %3 = vector.shape_cast %2 : vector<1x1x8x64xf32> to vector<8x64xf32>
    %cst = arith.constant dense<0xFF800000> : vector<64xf32>
    %4 = vector.multi_reduction <maximumf>, %3, %cst [0] : vector<8x64xf32> to vector<64xf32>
    %5 = vector.shape_cast %4 : vector<64xf32> to vector<1x64xf32>
    %6 = vector.broadcast %5 : vector<1x64xf32> to vector<8x64xf32>
    %7 = arith.subf %3, %6 : vector<8x64xf32>
    %8 = math.exp %7 : vector<8x64xf32>
    %cst_5 = arith.constant dense<0.000000e+00> : vector<64xf32>
    %9 = vector.multi_reduction <add>, %8, %cst_5 [0] : vector<8x64xf32> to vector<64xf32>
    %10 = vector.shape_cast %9 : vector<64xf32> to vector<1x64xf32>
    %cst_6 = arith.constant 0.000000e+00 : f32
    %11 = vector.broadcast %cst_6 : f32 to vector<1x64xf32>
    %12 = arith.subf %11, %1 : vector<1x64xf32>
    %13 = math.exp %12 : vector<1x64xf32>
    %cst_7 = arith.constant 1.000000e+00 : f32
    %14 = vector.broadcast %cst_7 : f32 to vector<1x64xf32>
    %15 = arith.addf %14, %13 : vector<1x64xf32>
    %16 = arith.mulf %15, %10 : vector<1x64xf32>
    %17 = tpu.reciprocal %16 {approx = true} : vector<1x64xf32> -> vector<1x64xf32>
    %18 = vector.broadcast %17 : vector<1x64xf32> to vector<8x64xf32>
    %19 = arith.mulf %8, %18 : vector<8x64xf32>
    %cst_8 = arith.constant dense<0xFF800000> : vector<8xf32>
    %20 = vector.multi_reduction <maximumf>, %19, %cst_8 [1] : vector<8x64xf32> to vector<8xf32>
    %21 = vector.shape_cast %20 : vector<8xf32> to vector<8x1xf32>
    %c0_i32 = arith.constant 0 : i32
    %22 = arith.cmpi eq, %arg1, %c0_i32 : i32
    %23 = arith.extui %22 : i1 to i32
    %c0_i32_9 = arith.constant 0 : i32
    %24 = arith.cmpi ne, %23, %c0_i32_9 : i32
    scf.if %24 {
      %c0_13 = arith.constant 0 : index
      %c0_14 = arith.constant 0 : index
      %31 = vector.load %arg4[%c0_13, %c0_14] : memref<8x1xf32, #tpu.memory_space<vmem>>, vector<8x1xf32>
      tpu.vector_store %arg4[%c0_13, %c0_14], %21 {strides = array<i32>} : memref<8x1xf32, #tpu.memory_space<vmem>>, vector<8x1xf32>,
    } else {
    }
    %c0_i32_10 = arith.constant 0 : i32
    %25 = arith.cmpi sgt, %arg1, %c0_i32_10 : i32
    %26 = arith.extui %25 : i1 to i32
    %c0_i32_11 = arith.constant 0 : i32
    %27 = arith.cmpi ne, %26, %c0_i32_11 : i32
    scf.if %27 {
      %c0_13 = arith.constant 0 : index
      %c0_14 = arith.constant 0 : index
      %31 = vector.load %arg4[%c0_13, %c0_14] : memref<8x1xf32, #tpu.memory_space<vmem>>, vector<8x1xf32>
      %32 = arith.maximumf %31, %21 : vector<8x1xf32>
      %c0_15 = arith.constant 0 : index
      %c0_16 = arith.constant 0 : index
      %33 = vector.load %arg4[%c0_15, %c0_16] : memref<8x1xf32, #tpu.memory_space<vmem>>, vector<8x1xf32>
      tpu.vector_store %arg4[%c0_15, %c0_16], %32 {strides = array<i32>} : memref<8x1xf32, #tpu.memory_space<vmem>>, vector<8x1xf32>,
    } else {
    }
    %c4_i32 = arith.constant 4 : i32
    %28 = arith.cmpi eq, %arg1, %c4_i32 : i32
    %29 = arith.extui %28 : i1 to i32
    %c0_i32_12 = arith.constant 0 : i32
    %30 = arith.cmpi ne, %29, %c0_i32_12 : i32
    scf.if %30 {
      %c0_13 = arith.constant 0 : index
      %c0_14 = arith.constant 0 : index
      %31 = vector.load %arg4[%c0_13, %c0_14] : memref<8x1xf32, #tpu.memory_space<vmem>>, vector<8x1xf32>
      %c0_15 = arith.constant 0 : index
      %c0_16 = arith.constant 0 : index
      %c0_17 = arith.constant 0 : index
      %32 = vector.load %arg3[%c0_15, %c0_16, %c0_17] : memref<1x8x1xf32, #tpu.memory_space<vmem>>, vector<1x8x1xf32>
      %33 = vector.shape_cast %32 : vector<1x8x1xf32> to vector<8x1xf32>
      %34 = vector.shape_cast %31 : vector<8x1xf32> to vector<1x8x1xf32>
      tpu.vector_store %arg3[%c0_15, %c0_16, %c0_17], %34 {strides = array<i32>} : memref<1x8x1xf32, #tpu.memory_space<vmem>>, vector<1x8x1xf32>,
    } else {
    }
    return
  }
  func.func @transform_0(%arg0: i32, %arg1: i32) -> (i32, i32, i32, i32) {
    %c0_i32 = arith.constant 0 : i32
    %c0_i32_0 = arith.constant 0 : i32
    %c0_i32_1 = arith.constant 0 : i32
    return %arg0, %arg1, %c0_i32, %c0_i32_0 : i32, i32, i32, i32
  }
  func.func @transform_1(%arg0: i32, %arg1: i32) -> (i32, i32, i32) {
    %c0_i32 = arith.constant 0 : i32
    %c0_i32_0 = arith.constant 0 : i32
    %c0_i32_1 = arith.constant 0 : i32
    return %arg0, %c0_i32, %c0_i32_0 : i32, i32, i32
  }
}

</mosaic_0001>

<bundles_post_ra>
// kernel: per_class_max_pallas.1
= control target key start
LH: loop header
LB: loop body
LE: loop exit
PB: predicated region body
PF: predicated region fallthrough
CT: control target
= control target key end

     0   :  { %s379_s6 = smov 0   ;;  %s381_s7 = smov 0   ;;  %s443_s0 = inlined_call_operand.vmem [shape: f32[2,5,13,64], index: 0, kind: input, shape index: {}]   ;;  %s444_s1 = inlined_call_operand.vmem [shape: f32[2,8,1], index: 1, kind: output, shape index: {}]  }
   0x1   :  { %s383_s8 = smov 0   ;;  %s385_s9 = smov 0  }
   0x2   :  { %s387_s10 = smov 0  }
   0x3 LB: > { %s20_s11 = sadd.s32 1, %s359_s8  ;;  %s23_s12 = sadd.s32 1, %s363_s9  ;;  %s367_s10 = sphi %s387_s10, %s11_s10   ;;  %s363_s9 = sphi %s385_s9, %s448_s9   ;;  %s359_s8 = sphi %s383_s8, %s447_s8   ;;  %s355_s7 = sphi %s381_s7, %s446_s7   ;;  %s351_s6 = sphi %s379_s6, %s445_s6  }
   0x4   : > { %p21_p0 = scmp.ge.s32.totalorder %s20_s11, 5  ;;  %p273_p1 = scmp.ge.s32.totalorder %s367_s10, 1 }
   0x5   : > { %p105_p2 = scmp.lt.s32.totalorder %s367_s10, 11 }
   0x6   : > { %s450_s11 = smov (%p21_p0, %s20_s11), 0  ;;  %s452_s12 = smov (!%p21_p0, %s23_s12), %s363_s9 }
   0x7   : > { %p106_p3 = pnand %p273_p1, %p105_p2  ;;  %p25_p4 = scmp.ge.s32.totalorder %s452_s12, 2 }
   0x8   : > { %p128_p5 = scmp.lt.s32.totalorder (!%p106_p3), %s355_s7, 1  ;;  %p130_p6 = scmp.lt.s32.totalorder (!%p106_p3), %s351_s6, 4 }
   0x9   : > { %s454_s12 = smov (%p25_p4, %s452_s12), 0  ;;  %109 = sbr.rel (%p106_p3) target bundleno = 247 (0xf7), region = 24 }
   0xa   : > { %p277_p7 = scmp.ne.s32.totalorder (!%p106_p3), %s351_s6, 0 }
   0xe   : > { %s456_s7 = smov (!%p128_p5, %s355_s7), 1  ;;  %vm143_vm0 = vcmask 523264   ;;  %v167_v24 = vlaneseq }
   0xf   : > { %s131_s13 = scalar_select %p130_p6, %s351_s6, 4 }
  0x10   : > { %s282_s14 = smul.u32 10, %s456_s7  ;;  %s276_s15 = sshll.u32 %s456_s7, 3  ;;  %v168_v25 = vshrl.u32 %v167_v24, 7 }
  0x11   : > { %s274_s16 = sshll.u32 %s131_s13, 1  ;;  %s416_s19 = scalar_lea.vmem %s444_s1, %s276_s15 }
  0x12   : > { %s134_s20 = sadd.s32 %s282_s14, %s274_s16  ;;  %v169_v26 = vsub.s32 0, %v168_v25 }
  0x13   : > { %s275_s21 = sshll.u32 %s134_s20, 3 }
  0x14   : > { %s136_s24 = scalar_lea.vmem %s443_s0, %s275_s21 }
  0x15   : > { %v142_v0 = vld [vmem:[%s136_s24 + $0x5] sm:$0xff]  ;;  %v141_v8 = vld [vmem:[%s136_s24 + $0x4] sm:$0x1] }
  0x16   : > { %v144_v1 = vsel %vm143_vm0, %v142_v0, -inf  ;;  %v161_v11 = vsub.f32 0.0, %v141_v8 }
  0x17   : > { %v145_v2 = vrot.slane %v144_v1, 4 }
  0x18   : > { %v162_v12 = vmul.f32 1.442695, %v161_v11 }
  0x19   : > { %v146_v3 = vmax.f32 %v144_v1, %v145_v2 }
  0x1b   : > { %v147_v4 = vrot.slane %v146_v3, 2 }
  0x1d   : > { %v148_v5 = vmax.f32 %v146_v3, %v147_v4 }
  0x1f   : > { %v149_v6 = vrot.slane %v148_v5, 1 }
  0x21   : > { %v150_v7 = vmax.f32 %v148_v5, %v149_v6 }
  0x23   : > { %v151_v9 = vsub.f32 %v142_v0, %v150_v7 }
  0x25   : > { %v152_v10 = vmul.f32 1.442695, %v151_v9 }
  0x27   : > { %323 = vpow2.f32 %v152_v10 }
  0x28   : > { %325 = vpow2.f32 %v162_v12 }
  0x34   : > { %v324_v13 = vpop.eup %323 }
  0x35   : > { %v154_v14 = vsel %vm143_vm0, %v324_v13, 0.0  ;;  %v326_v18 = vpop.eup %325 }
  0x36   : > { %v155_v15 = vrot.slane %v154_v14, 4  ;;  %v164_v21 = vadd.f32 1.0, %v326_v18 }
  0x38   : > { %v156_v16 = vadd.f32 %v155_v15, %v154_v14 }
  0x3a   : > { %v157_v17 = vrot.slane %v156_v16, 2 }
  0x3c   : > { %v158_v19 = vadd.f32 %v157_v17, %v156_v16 }
  0x3e   : > { %v159_v20 = vrot.slane %v158_v19, 1 }
  0x40   : > { %v160_v22 = vadd.f32 %v159_v20, %v158_v19 }
  0x42   : > { %v165_v23 = vmul.f32 %v164_v21, %v160_v22 }
  0x44   : > { %327 = vrcp.f32 %v165_v23 }
  0x51   : > { %v328_v27 = vpop.eup %327 }
  0x52   : > { %v170_v28 = vrot.slane %v328_v27, %v169_v26 }
  0x54   : > { %v171_v29 = vmul.f32 %v324_v13, %v170_v28 }
  0x56   : > { %v172_v30 = vsel %vm143_vm0, %v171_v29, -inf }
  0x57   : > { %173 = vmax.xlane.f32.xlu0 %v172_v30 }
  0xdc   : > { %178 = sbr.rel (%p277_p7) target bundleno = 227 (0xe3), region = 28 }
  0xe0   : > { %v174_v31 = vpop.xlane.xlu0 %173 }
  0xe1   : > { %vm179_vm1 = vcmask 7168  }
  0xe2   : > { %180 = vst.msk [vmem:[#allocation2] sm:$0xff] %vm179_vm1, %v174_v31 }
  0xe3 PF: > { %p278_p8 = scmp.le.s32.totalorder %s351_s6, 0 }
  0xe5   : > { %184 = sbr.rel (%p278_p8) target bundleno = 238 (0xee), region = 32 }
  0xea   : > { %v185_v32 = vld [vmem:[#allocation2] sm:$0xff]  ;;  %vm187_vm2 = vcmask 7168  }
  0xeb   : > { %v186_v33 = vmax.f32 %v185_v32, %v174_v31 }
  0xed   : > { %188 = vst.msk [vmem:[#allocation2] sm:$0xff] %vm187_vm2, %v186_v33 }
  0xee PF: > { %p279_p9 = scmp.ne.s32.totalorder %s351_s6, 4 }
  0xf0   : > { %192 = sbr.rel (%p279_p9) target bundleno = 247 (0xf7), region = 36 }
  0xf5   : > { %v193_v34 = vld [vmem:[#allocation2] sm:$0xff]  ;;  %vm194_vm3 = vcmask 7168  }
  0xf6   : > { %195 = vst.msk [vmem:[%s416_s19] sm:$0xff] %vm194_vm3, %v193_v34 }
  0xf7 PF: > { %s11_s10 = sadd.s32 1, %s367_s10   ;;  %s445_s6 = smov %s359_s8 }
  0xf8   : > { %p8_p10 = scmp.ge.s32.totalorder %s11_s10, 12   ;;  %s446_s7 = smov %s363_s9 }
  0xf9   : > { %s447_s8 = smov %s450_s11  ;;  %s448_s9 = smov %s454_s12 }
  0xfa   :  { %10 = sbr.rel (!%p8_p10) target bundleno = 3 (0x3), region = 66 }

</bundles_post_ra>
